<compile_context>
chip_gen: v7x
topology: tpu7x:2x2x1
jax: 0.10.0
libtpu: 0.0.40
codegen_flags: <defaults>
</compile_context>

<pallas_src>
import functools

import jax
import jax.numpy as jnp
from jax.experimental import pallas as pl
from jax.experimental.pallas import tpu as pltpu


def _round_up(n, m):
    return ((n + m - 1) // m) * m


def _fused_double_q_kernel(x_ref, w_ref, b_ref, out_ref, *, dp, h2):
    """One batch tile of the fused twin-Q MLP.

    x_ref  : (TB, Dp)  bf16  input rows (zero-padded features)
    w_ref  : (Pw, 2H)  bf16  [W1f ; W2f ; W3f^T] packed weight slab
    b_ref  : (24, 2H)  f32   b1f @ row 0, b2f @ row 8, b3 @ rows 16/17 col 0
    out_ref: (2, TB)   f32   [q1 ; q2] with the batch on the lane axis
    """
    x = x_ref[...]                                    # (TB, Dp) bf16

    w1 = w_ref[0:dp, :]                               # (Dp, 2H) bf16
    w2 = w_ref[dp:dp + h2, :]                         # (2H, 2H) bf16 (block-diag)
    w3t = w_ref[dp + h2:dp + h2 + 2, :]               # (2, 2H)  bf16

    b1 = b_ref[0:1, :]                                # (1, 2H) f32
    b2 = b_ref[8:9, :]                                # (1, 2H) f32
    b3 = b_ref[16:18, 0:1]                            # (2, 1)  f32

    # layer 1 + ReLU (f32 accumulate / f32 epilogue, bf16 feed to next MXU pass)
    h = jnp.dot(x, w1, preferred_element_type=jnp.float32) + b1
    h = jnp.maximum(h, 0.0).astype(jnp.bfloat16)      # (TB, 2H)

    # layer 2 + ReLU (block-diagonal W2 keeps the two heads independent)
    h = jnp.dot(h, w2, preferred_element_type=jnp.float32) + b2
    h = jnp.maximum(h, 0.0).astype(jnp.bfloat16)      # (TB, 2H)

    # layer 3, computed transposed: q^T = W3f^T @ h^T -> (2, TB) so the
    # output store is lane-dense (batch on the lane axis).
    qt = jax.lax.dot_general(
        w3t, h, (((1,), (1,)), ((), ())),
        preferred_element_type=jnp.float32)           # (2, TB)
    out_ref[...] = qt + b3


@jax.jit
def double_q_forward(x, params1, params2):
    """x: (B, D) float32.  Returns (q1, q2), each (B,) float32."""
    B, D = x.shape
    H = params1["w1"].shape[1]
    H2 = 2 * H

    Dp = _round_up(max(D, 1), 32)                 # K-aligned feature dim
    TB = min(512, _round_up(max(B, 1), 128))      # batch tile (lane-dense output)
    Bp = _round_up(B, TB)

    # ---- pack fused weights into a single bf16 slab ----------------------
    Pw = Dp + H2 + 8                                   # 8-row aligned tail for W3^T
    w1f = jnp.concatenate([params1["w1"], params2["w1"]], axis=1)       # (D, 2H)
    zh = jnp.zeros((H, H), jnp.float32)
    w2f = jnp.concatenate(
        [jnp.concatenate([params1["w2"], zh], axis=1),
         jnp.concatenate([zh, params2["w2"]], axis=1)], axis=0)         # (2H, 2H)
    w3f_t = jnp.zeros((2, H2), jnp.float32)
    w3f_t = w3f_t.at[0, :H].set(params1["w3"][:, 0])
    w3f_t = w3f_t.at[1, H:].set(params2["w3"][:, 0])                    # (2, 2H)

    wslab = jnp.zeros((Pw, H2), jnp.float32)
    wslab = wslab.at[:D, :].set(w1f)                       # rows [0, D)
    wslab = wslab.at[Dp:Dp + H2, :].set(w2f)               # rows [Dp, Dp+2H)
    wslab = wslab.at[Dp + H2:Dp + H2 + 2, :].set(w3f_t)    # rows [Dp+2H, +2)
    wslab = wslab.astype(jnp.bfloat16)

    # ---- pack biases into a small f32 slab (8-row aligned sections) ------
    bslab = jnp.zeros((24, H2), jnp.float32)
    bslab = bslab.at[0, :].set(
        jnp.concatenate([params1["b1"], params2["b1"]], axis=1)[0])
    bslab = bslab.at[8, :].set(
        jnp.concatenate([params1["b2"], params2["b2"]], axis=1)[0])
    bslab = bslab.at[16, 0].set(params1["b3"][0, 0])
    bslab = bslab.at[17, 0].set(params2["b3"][0, 0])

    # ---- pad + cast activations ------------------------------------------
    xp = jnp.pad(x, ((0, Bp - B), (0, Dp - D))).astype(jnp.bfloat16)

    kernel = functools.partial(_fused_double_q_kernel, dp=Dp, h2=H2)
    out = pl.pallas_call(
        kernel,
        out_shape=jax.ShapeDtypeStruct((2, Bp), jnp.float32),
        grid=(Bp // TB,),
        in_specs=[
            pl.BlockSpec((TB, Dp), lambda i: (i, 0)),     # batch-tiled x
            pl.BlockSpec((Pw, H2), lambda i: (0, 0)),     # weights: VMEM-resident
            pl.BlockSpec((24, H2), lambda i: (0, 0)),     # biases:  VMEM-resident
        ],
        out_specs=pl.BlockSpec((2, TB), lambda i: (0, i)),
        compiler_params=pltpu.CompilerParams(
            dimension_semantics=("parallel",)),
    )(xp, wslab, bslab)

    q = out[:, :B]                  # drop batch padding
    return q[0], q[1]               # torch.squeeze(q_value, -1) per head


def _init_qfunc_params(key, input_dim, hid_size):
    """Deterministic synthetic init for one Qfunc MLP: [D, H, H, 1]."""
    ks = jax.random.split(key, 6)

    def lin(kw, kb, fan_in, fan_out):
        bound = 1.0 / jnp.sqrt(fan_in)
        w = jax.random.uniform(kw, (fan_in, fan_out), jnp.float32, -bound, bound)
        b = jax.random.uniform(kb, (1, fan_out), jnp.float32, -bound, bound)
        return w, b

    w1, b1 = lin(ks[0], ks[1], input_dim, hid_size)
    w2, b2 = lin(ks[2], ks[3], hid_size, hid_size)
    w3, b3 = lin(ks[4], ks[5], hid_size, 1)
    return dict(w1=w1, b1=b1, w2=w2, b2=b2, w3=w3, b3=b3)


def _mlp_ref_f32(x, p):
    h = jnp.maximum(x @ p["w1"] + p["b1"], 0.0)
    h = jnp.maximum(h @ p["w2"] + p["b2"], 0.0)
    return jnp.squeeze(h @ p["w3"] + p["b3"], -1)


def _mlp_ref_bf16(x, p):
    """Plain-JAX reference with the same bf16-in / f32-accumulate recipe."""
    h = jnp.dot(x.astype(jnp.bfloat16), p["w1"].astype(jnp.bfloat16),
                preferred_element_type=jnp.float32) + p["b1"]
    h = jnp.maximum(h, 0.0).astype(jnp.bfloat16)
    h = jnp.dot(h, p["w2"].astype(jnp.bfloat16),
                preferred_element_type=jnp.float32) + p["b2"]
    h = jnp.maximum(h, 0.0).astype(jnp.bfloat16)
    q = jnp.dot(h, p["w3"].astype(jnp.bfloat16),
                preferred_element_type=jnp.float32) + p["b3"]
    return jnp.squeeze(q, -1)


if __name__ == "__main__":
    # env_params: obs=10, goal=3, action=4 ; args: hid_size=32, n_hids=2, activ=ReLU
    obs_dim, goal_dim, act_dim = 10, 3, 4
    hid_size = 32
    batch = 8
    input_dim = obs_dim + goal_dim + act_dim

    key = jax.random.PRNGKey(0)
    k_obs, k_goal, k_act, k_q1, k_q2 = jax.random.split(key, 5)

    obs = jax.random.normal(k_obs, (batch, obs_dim), jnp.float32)
    goal = jax.random.normal(k_goal, (batch, goal_dim), jnp.float32)
    action = jax.random.normal(k_act, (batch, act_dim), jnp.float32)

    # forward(*args) -> torch.cat([*args], dim=-1)
    x = jnp.concatenate([obs, goal, action], axis=-1)

    params1 = _init_qfunc_params(k_q1, input_dim, hid_size)
    params2 = _init_qfunc_params(k_q2, input_dim, hid_size)

    q1, q2 = double_q_forward(x, params1, params2)
    jax.block_until_ready((q1, q2))

    assert q1.shape == (batch,) and q2.shape == (batch,)

    # tight check against a plain-JAX reference using the same bf16/f32 recipe
    q1_bf = _mlp_ref_bf16(x, params1)
    q2_bf = _mlp_ref_bf16(x, params2)
    assert jnp.allclose(q1, q1_bf, atol=1e-3, rtol=1e-3)
    assert jnp.allclose(q2, q2_bf, atol=1e-3, rtol=1e-3)

    # loose sanity check against the full-f32 PyTorch-equivalent math
    q1_f32 = _mlp_ref_f32(x, params1)
    q2_f32 = _mlp_ref_f32(x, params2)
    assert jnp.allclose(q1, q1_f32, atol=5e-2, rtol=5e-2)
    assert jnp.allclose(q2, q2_f32, atol=5e-2, rtol=5e-2)

    print("KERNEL_OK")
</pallas_src>

<mosaic_0001>
module attributes {stable_mosaic.version = 11 : i64} {
  func.func @_fused_double_q_kernel(%arg0: i32, %arg1: memref<128x32xbf16, #tpu.memory_space<vmem>>, %arg2: memref<104x64xbf16, #tpu.memory_space<vmem>>, %arg3: memref<24x64xf32, #tpu.memory_space<vmem>>, %arg4: memref<2x128xf32, #tpu.memory_space<vmem>>) attributes {dimension_semantics = [#tpu.dimension_semantics<parallel>], iteration_bounds = array<i64: 1>, scalar_prefetch = 0 : i64, scratch_operands = 0 : i64, tpu.core_type = #tpu.core_type<tc>, window_params = [{transform_indices = @transform_0, window_bounds = array<i64: 128, 32>}, {pipeline_mode = #tpu.pipeline_mode<synchronous>, transform_indices = @transform_1, window_bounds = array<i64: 104, 64>}, {pipeline_mode = #tpu.pipeline_mode<synchronous>, transform_indices = @transform_2, window_bounds = array<i64: 24, 64>}, {transform_indices = @transform_3, window_bounds = array<i64: 2, 128>}]} {
    %c0 = arith.constant 0 : index
    %c0_0 = arith.constant 0 : index
    %0 = vector.load %arg1[%c0, %c0_0] : memref<128x32xbf16, #tpu.memory_space<vmem>>, vector<128x32xbf16>
    %c0_1 = arith.constant 0 : index
    %c0_2 = arith.constant 0 : index
    %1 = vector.load %arg2[%c0_1, %c0_2] : memref<104x64xbf16, #tpu.memory_space<vmem>>, vector<32x64xbf16>
    %c32 = arith.constant 32 : index
    %c0_3 = arith.constant 0 : index
    %2 = vector.load %arg2[%c32, %c0_3] : memref<104x64xbf16, #tpu.memory_space<vmem>>, vector<64x64xbf16>
    %c96 = arith.constant 96 : index
    %c0_4 = arith.constant 0 : index
    %3 = vector.load %arg2[%c96, %c0_4] : memref<104x64xbf16, #tpu.memory_space<vmem>>, vector<2x64xbf16>
    %c0_5 = arith.constant 0 : index
    %c0_6 = arith.constant 0 : index
    %4 = vector.load %arg3[%c0_5, %c0_6] : memref<24x64xf32, #tpu.memory_space<vmem>>, vector<1x64xf32>
    %c8 = arith.constant 8 : index
    %c0_7 = arith.constant 0 : index
    %5 = vector.load %arg3[%c8, %c0_7] : memref<24x64xf32, #tpu.memory_space<vmem>>, vector<1x64xf32>
    %c16 = arith.constant 16 : index
    %c0_8 = arith.constant 0 : index
    %6 = vector.load %arg3[%c16, %c0_8] : memref<24x64xf32, #tpu.memory_space<vmem>>, vector<2x1xf32>
    %cst = arith.constant dense<0.000000e+00> : vector<128x64xf32>
    %7 = tpu.matmul %0, %1, %cst {dimension_numbers = #tpu.dot_dimension_numbers<[1], [0], [0], [1], [0, 0, 1, 1], [], []>} : vector<128x32xbf16>, vector<32x64xbf16>, vector<128x64xf32> -> vector<128x64xf32>
    %8 = vector.broadcast %4 : vector<1x64xf32> to vector<128x64xf32>
    %9 = arith.addf %7, %8 : vector<128x64xf32>
    %cst_9 = arith.constant 0.000000e+00 : f32
    %10 = vector.broadcast %cst_9 : f32 to vector<128x64xf32>
    %11 = arith.maximumf %9, %10 : vector<128x64xf32>
    %12 = arith.truncf %11 : vector<128x64xf32> to vector<128x64xbf16>
    %cst_10 = arith.constant dense<0.000000e+00> : vector<128x64xf32>
    %13 = tpu.matmul %12, %2, %cst_10 {dimension_numbers = #tpu.dot_dimension_numbers<[1], [0], [0], [1], [0, 0, 1, 1], [], []>} : vector<128x64xbf16>, vector<64x64xbf16>, vector<128x64xf32> -> vector<128x64xf32>
    %14 = vector.broadcast %5 : vector<1x64xf32> to vector<128x64xf32>
    %15 = arith.addf %13, %14 : vector<128x64xf32>
    %cst_11 = arith.constant 0.000000e+00 : f32
    %16 = vector.broadcast %cst_11 : f32 to vector<128x64xf32>
    %17 = arith.maximumf %15, %16 : vector<128x64xf32>
    %18 = arith.truncf %17 : vector<128x64xf32> to vector<128x64xbf16>
    %cst_12 = arith.constant dense<0.000000e+00> : vector<2x128xf32>
    %19 = tpu.matmul %3, %18, %cst_12 {dimension_numbers = #tpu.dot_dimension_numbers<[1], [1], [0], [0], [0, 0, 1, 0], [], []>} : vector<2x64xbf16>, vector<128x64xbf16>, vector<2x128xf32> -> vector<2x128xf32>
    %20 = vector.broadcast %6 : vector<2x1xf32> to vector<2x128xf32>
    %21 = arith.addf %19, %20 : vector<2x128xf32>
    %c0_13 = arith.constant 0 : index
    %c0_14 = arith.constant 0 : index
    %22 = vector.load %arg4[%c0_13, %c0_14] : memref<2x128xf32, #tpu.memory_space<vmem>>, vector<2x128xf32>
    tpu.vector_store %arg4[%c0_13, %c0_14], %21 {strides = array<i32>} : memref<2x128xf32, #tpu.memory_space<vmem>>, vector<2x128xf32>,
    return
  }
  func.func @transform_0(%arg0: i32) -> (i32, i32) {
    %c0_i32 = arith.constant 0 : i32
    %c0_i32_0 = arith.constant 0 : i32
    return %arg0, %c0_i32 : i32, i32
  }
  func.func @transform_1(%arg0: i32) -> (i32, i32) {
    %c0_i32 = arith.constant 0 : i32
    %c0_i32_0 = arith.constant 0 : i32
    %c0_i32_1 = arith.constant 0 : i32
    return %c0_i32, %c0_i32_0 : i32, i32
  }
  func.func @transform_2(%arg0: i32) -> (i32, i32) {
    %c0_i32 = arith.constant 0 : i32
    %c0_i32_0 = arith.constant 0 : i32
    %c0_i32_1 = arith.constant 0 : i32
    return %c0_i32, %c0_i32_0 : i32, i32
  }
  func.func @transform_3(%arg0: i32) -> (i32, i32) {
    %c0_i32 = arith.constant 0 : i32
    %c0_i32_0 = arith.constant 0 : i32
    return %c0_i32, %arg0 : i32, i32
  }
}

</mosaic_0001>

<bundles_post_ra>
// kernel: double_q_forward.1
= control target key start
LH: loop header
LB: loop body
LE: loop exit
PB: predicated region body
PF: predicated region fallthrough
CT: control target
= control target key end

     0   :  { %vm103_vm0 = vcmask 261120   ;;  %vm277_vm1 = vcmask 523264   ;;  %vm647_vm2 = vmmov 0   ;;  %s760_s1 = inlined_call_operand.vmem [shape: bf16[104,64], index: 1, kind: input, shape index: {}]   ;;  %s761_s0 = inlined_call_operand.vmem [shape: bf16[128,32], index: 0, kind: input, shape index: {}]   ;;  %s762_s2 = inlined_call_operand.vmem [shape: f32[24,64], index: 2, kind: input, shape index: {}]   ;;  %s763_s3 = inlined_call_operand.vmem [shape: f32[2,128], index: 3, kind: output, shape index: {}]  }
   0x1   :  { %v632_v0 = vld [vmem:[%s760_s1] sm:$0xff]   ;;  %v633_v1 = vld [vmem:[%s760_s1 + $0x8] sm:$0xff]   ;;  %v636_v4 = vld [vmem:[%s761_s0 + $0x10] sm:$0xff]  }
   0x2   :  { %564 = vmatprep.subr.bf16.mxu1 %v632_v0  ;;  %v634_v2 = vld [vmem:[%s761_s0] sm:$0xff]   ;;  %v635_v3 = vld [vmem:[%s761_s0 + $0x8] sm:$0xff]   ;;  %v642_v5 = vld [vmem:[%s760_s1 + $0x10] sm:$0xff]  }
   0x3   :  { %565 = vmatpush3.bf16.msra.mxu1 %v632_v0  ;;  %568 = vmatprep.mubr.msk.bf16.mxu1 %vm103_vm0, %v634_v2  ;;  %v643_v6 = vld [vmem:[%s760_s1 + $0x18] sm:$0xff]   ;;  %v644_v8 = vld [vmem:[%s760_s1 + $0x20] sm:$0xff]   ;;  %v639_v10 = vld [vmem:[%s761_s0 + $0x28] sm:$0xff]  }
   0x4   :  { %566 = vmatprep.subr.bf16.mxu1 %v633_v1  ;;  %v637_v7 = vld [vmem:[%s761_s0 + $0x18] sm:$0xff]   ;;  %v638_v9 = vld [vmem:[%s761_s0 + $0x20] sm:$0xff]   ;;  %v640_v11 = vld [vmem:[%s761_s0 + $0x30] sm:$0xff]  }
   0x5   :  { %v641_v12 = vld [vmem:[%s761_s0 + $0x38] sm:$0xff]   ;;  %v645_v13 = vld [vmem:[%s760_s1 + $0x28] sm:$0xff]   ;;  %v500_v14 = vld [vmem:[%s762_s2] ss:$0 sm:$0xff] }
   0x7   :  { %567 = vmatpush3.bf16.msra.mxu1 %v633_v1 }
   0x8   :  { %584 = vmatprep.subr.bf16.mxu1 %v642_v5 }
   0xa   :  { %569 = vmatmul.mubr.msk.bf16.vlgmr.msra.gmra.mrb[0].mxu1 %vm103_vm0, %v635_v3 }
   0xb   :  { %572 = vmatprep.mubr.msk.bf16.mxu1 %vm103_vm0, %v636_v4  ;;  %585 = vmatpush3.bf16.msra.mxu1 %v642_v5 }
   0xc   :  { %586 = vmatprep.subr.bf16.mxu1 %v643_v6 }
   0xf   :  { %587 = vmatpush3.bf16.msra.mxu1 %v643_v6 }
  0x10   :  { %588 = vmatprep.subr.bf16.mxu1 %v644_v8 }
  0x12   :  { %573 = vmatmul.mubr.msk.bf16.gmra.mrb[4].mxu1 %vm103_vm0, %v637_v7  ;;  %v646_v7 = vmov 0.0  }
  0x13   :  { %576 = vmatprep.mubr.msk.bf16.mxu1 %vm103_vm0, %v638_v9  ;;  %589 = vmatpush3.bf16.msra.mxu1 %v644_v8  ;;  %v46_v8 = vld [vmem:[%s762_s2 + $0x10] sm:$0x3]  ;;  %v648_v9 = vmov 0  }
  0x14   :  { %590 = vmatprep.subr.bf16.mxu1 %v645_v13  ;;  %608 = vmatprep.subr.bf16.mxu0 %v646_v7 }
  0x15   :  { %624 = vmatprep.mubr.msk.bf16.mxu0 %vm647_vm2, %v646_v7  ;;  %631 = vset.pattern.permute.xlu0 %v648_v9 }
  0x16   :  { %425 = vperm.xlu0 %631, %v46_v8  }
  0x17   :  { %591 = vmatpush3.bf16.msra.mxu1 %v645_v13 }
  0x1a   :  { %577 = vmatmul.mubr.msk.bf16.gmra.mrb[8].mxu1 %vm103_vm0, %v639_v10  ;;  %v519_v10 = vld [vmem:[%s762_s2 + $0x8] ss:$0 sm:$0xff] }
  0x1b   :  { %580 = vmatprep.mubr.msk.bf16.mxu1 %vm103_vm0, %v640_v11 }
  0x22   :  { %581 = vmatmul.mubr.msk.bf16.gmra.mrb[12].mxu1 %vm103_vm0, %v641_v12 }
  0xdd   :  { %v570_v15 = vpop.f32.mrb[0].mxu1 }
  0xde   :  { %v171_v16 = vadd.f32 %v570_v15, %v500_v14  ;;  %v162_v17 = vpop.f32.mrb[1].mxu1 }
  0xdf   :  { %v163_v18 = vadd.f32 %v500_v14, %v162_v17  ;;  %v571_v19 = vpop.f32.mrb[2].mxu1 }
  0xe0   :  { %v174_v20 = vadd.f32 %v571_v19, %v500_v14  ;;  %v165_v21 = vpop.f32.mrb[3].mxu1  ;;  %v227_v23 = vmax.f32 %v171_v16, 0.0 }
  0xe1   :  { %v166_v22 = vadd.f32 %v500_v14, %v165_v21  ;;  %v225_v25 = vmax.f32 %v163_v18, 0.0 }
  0xe2   :  { %v228_v24 = vmax.f32 %v174_v20, 0.0 }
  0xe3   :  { %v226_v26 = vmax.f32 %v166_v22, 0.0 }
  0xe4   :  { %v242_v27 = vpack.c.bf16 %v228_v24, %v227_v23 }
  0xe5   :  { %v241_v28 = vpack.c.bf16 %v226_v26, %v225_v25  ;;  %v574_v29 = vpop.f32.mrb[4].mxu1 }
  0xe6   :  { %v187_v30 = vadd.f32 %v574_v29, %v500_v14  ;;  %v178_v31 = vpop.f32.mrb[5].mxu1 }
  0xe7   :  { %v179_v32 = vadd.f32 %v500_v14, %v178_v31  ;;  %592 = vmatprep.mubr.msk.bf16.mxu1 %vm277_vm1, %v241_v28  ;;  %v575_v33 = vpop.f32.mrb[6].mxu1 }
  0xe8   :  { %v231_v34 = vmax.f32 %v187_v30, 0.0  ;;  %v190_v35 = vadd.f32 %v575_v33, %v500_v14  ;;  %593 = vmatmul.mubr.msk.bf16.vlgmr.msra.gmra.mrb[16].mxu1 %vm277_vm1, %v242_v27  ;;  %v181_v36 = vpop.f32.mrb[7].mxu1 }
  0xe9   :  { %v229_v37 = vmax.f32 %v179_v32, 0.0  ;;  %v182_v38 = vadd.f32 %v500_v14, %v181_v36 }
  0xea   :  { %v232_v39 = vmax.f32 %v190_v35, 0.0 }
  0xeb   :  { %v230_v40 = vmax.f32 %v182_v38, 0.0 }
  0xec   :  { %v244_v41 = vpack.c.bf16 %v232_v39, %v231_v34 }
  0xed   :  { %v243_v42 = vpack.c.bf16 %v230_v40, %v229_v37  ;;  %v578_v43 = vpop.f32.mrb[8].mxu1 }
  0xee   :  { %v203_v44 = vadd.f32 %v578_v43, %v500_v14  ;;  %v194_v45 = vpop.f32.mrb[9].mxu1 }
  0xef   :  { %596 = vmatprep.mubr.msk.bf16.mxu1 %vm277_vm1, %v243_v42  ;;  %v195_v46 = vadd.f32 %v500_v14, %v194_v45  ;;  %v579_v47 = vpop.f32.mrb[10].mxu1 }
  0xf0   :  { %597 = vmatmul.mubr.msk.bf16.gmra.mrb[20].mxu1 %vm277_vm1, %v244_v41  ;;  %v235_v48 = vmax.f32 %v203_v44, 0.0  ;;  %v206_v49 = vadd.f32 %v579_v47, %v500_v14  ;;  %v197_v50 = vpop.f32.mrb[11].mxu1 }
  0xf1   :  { %v233_v51 = vmax.f32 %v195_v46, 0.0  ;;  %v198_v52 = vadd.f32 %v500_v14, %v197_v50 }
  0xf2   :  { %v236_v53 = vmax.f32 %v206_v49, 0.0 }
  0xf3   :  { %v234_v54 = vmax.f32 %v198_v52, 0.0 }
  0xf4   :  { %v246_v55 = vpack.c.bf16 %v236_v53, %v235_v48 }
  0xf5   :  { %v245_v56 = vpack.c.bf16 %v234_v54, %v233_v51  ;;  %v582_v57 = vpop.f32.mrb[12].mxu1 }
  0xf6   :  { %v219_v58 = vadd.f32 %v582_v57, %v500_v14  ;;  %v210_v59 = vpop.f32.mrb[13].mxu1 }
  0xf7   :  { %600 = vmatprep.mubr.msk.bf16.mxu1 %vm277_vm1, %v245_v56  ;;  %v211_v60 = vadd.f32 %v500_v14, %v210_v59  ;;  %v583_v61 = vpop.f32.mrb[14].mxu1 }
  0xf8   :  { %601 = vmatmul.mubr.msk.bf16.gmra.mrb[24].mxu1 %vm277_vm1, %v246_v55  ;;  %v239_v62 = vmax.f32 %v219_v58, 0.0  ;;  %v222_v63 = vadd.f32 %v583_v61, %v500_v14  ;;  %v213_v0 = vpop.f32.mrb[15].mxu1 }
  0xf9   :  { %v237_v1 = vmax.f32 %v211_v60, 0.0  ;;  %v214_v2 = vadd.f32 %v500_v14, %v213_v0 }
  0xfa   :  { %v240_v3 = vmax.f32 %v222_v63, 0.0 }
  0xfb   :  { %v238_v4 = vmax.f32 %v214_v2, 0.0 }
  0xfc   :  { %v248_v5 = vpack.c.bf16 %v240_v3, %v239_v62 }
  0xfd   :  { %v247_v6 = vpack.c.bf16 %v238_v4, %v237_v1 }
  0xff   :  { %604 = vmatprep.mubr.msk.bf16.mxu1 %vm277_vm1, %v247_v6 }
 0x100   :  { %605 = vmatmul.mubr.msk.bf16.gmra.mrb[28].mxu1 %vm277_vm1, %v248_v5 }
 0x1bb   :  { %v594_v11 = vpop.f32.mrb[16].mxu1 }
 0x1bc   :  { %v345_v12 = vadd.f32 %v594_v11, %v519_v10  ;;  %v336_v13 = vpop.f32.mrb[17].mxu1 }
 0x1bd   :  { %v337_v14 = vadd.f32 %v519_v10, %v336_v13  ;;  %v595_v15 = vpop.f32.mrb[18].mxu1  ;;  %v426_v13 = vpop.permute.xlu0 %425 }
 0x1be   :  { %v348_v16 = vadd.f32 %v595_v15, %v519_v10  ;;  %v339_v17 = vpop.f32.mrb[19].mxu1  ;;  %v401_v19 = vmax.f32 %v345_v12, 0.0  ;;  %v43_v12 = vld [vmem:[%s760_s1 + $0x30] sm:$0x1] }
 0x1bf   :  { %v340_v18 = vadd.f32 %v519_v10, %v339_v17  ;;  %v399_v21 = vmax.f32 %v337_v14, 0.0 }
 0x1c0   :  { %v402_v20 = vmax.f32 %v348_v16, 0.0 }
 0x1c1   :  { %v400_v22 = vmax.f32 %v340_v18, 0.0 }
 0x1c2   :  { %v416_v23 = vpack.c.bf16 %v402_v20, %v401_v19 }
 0x1c3   :  { %v598_v24 = vpop.f32.mrb[20].mxu1  ;;  %v415_v25 = vpack.c.bf16 %v400_v22, %v399_v21 }
 0x1c4   :  { %v361_v26 = vadd.f32 %v598_v24, %v519_v10  ;;  %v352_v27 = vpop.f32.mrb[21].mxu1  ;;  %v435_v43 = vsel %vm277_vm1, %v416_v23, 0 }
 0x1c5   :  { %v353_v28 = vadd.f32 %v519_v10, %v352_v27  ;;  %v599_v29 = vpop.f32.mrb[22].mxu1  ;;  %v432_v30 = vsel %vm277_vm1, %v415_v25, 0 }
 0x1c6   :  { %v405_v31 = vmax.f32 %v361_v26, 0.0  ;;  %v364_v32 = vadd.f32 %v599_v29, %v519_v10  ;;  %609 = vmatpush3.bf16.xpose.msra.mxu0 %v432_v30  ;;  %v355_v33 = vpop.f32.mrb[23].mxu1 }
 0x1c7   :  { %v403_v34 = vmax.f32 %v353_v28, 0.0  ;;  %v356_v35 = vadd.f32 %v519_v10, %v355_v33  ;;  %610 = vmatprep.subr.bf16.mxu0 %v646_v7 }
 0x1c8   :  { %v406_v36 = vmax.f32 %v364_v32, 0.0 }
 0x1c9   :  { %v404_v37 = vmax.f32 %v356_v35, 0.0 }
 0x1ca   :  { %v418_v38 = vpack.c.bf16 %v406_v36, %v405_v31 }
 0x1cb   :  { %v417_v39 = vpack.c.bf16 %v404_v37, %v403_v34  ;;  %v602_v40 = vpop.f32.mrb[24].mxu1 }
 0x1cc   :  { %v377_v41 = vadd.f32 %v602_v40, %v519_v10  ;;  %v368_v42 = vpop.f32.mrb[25].mxu1  ;;  %v441_v6 = vsel %vm277_vm1, %v418_v38, 0 }
 0x1cd   :  { %v369_v44 = vadd.f32 %v519_v10, %v368_v42  ;;  %v603_v45 = vpop.f32.mrb[26].mxu1  ;;  %v438_v58 = vsel %vm277_vm1, %v417_v39, 0 }
 0x1ce   :  { %611 = vmatpush3.bf16.xpose.msra.mxu0 %v435_v43  ;;  %v409_v46 = vmax.f32 %v377_v41, 0.0  ;;  %v380_v47 = vadd.f32 %v603_v45, %v519_v10  ;;  %v371_v48 = vpop.f32.mrb[27].mxu1 }
 0x1cf   :  { %v407_v49 = vmax.f32 %v369_v44, 0.0  ;;  %612 = vmatprep.subr.bf16.mxu0 %v646_v7  ;;  %v372_v50 = vadd.f32 %v519_v10, %v371_v48 }
 0x1d0   :  { %v410_v51 = vmax.f32 %v380_v47, 0.0 }
 0x1d1   :  { %v408_v52 = vmax.f32 %v372_v50, 0.0 }
 0x1d2   :  { %v420_v53 = vpack.c.bf16 %v410_v51, %v409_v46 }
 0x1d3   :  { %v419_v54 = vpack.c.bf16 %v408_v52, %v407_v49  ;;  %v606_v55 = vpop.f32.mrb[28].mxu1 }
 0x1d4   :  { %v393_v56 = vadd.f32 %v606_v55, %v519_v10  ;;  %v384_v57 = vpop.f32.mrb[29].mxu1  ;;  %v447_v9 = vsel %vm277_vm1, %v420_v53, 0 }
 0x1d5   :  { %v385_v59 = vadd.f32 %v519_v10, %v384_v57  ;;  %v607_v60 = vpop.f32.mrb[30].mxu1  ;;  %v444_v8 = vsel %vm277_vm1, %v419_v54, 0 }
 0x1d6   :  { %613 = vmatpush3.bf16.xpose.msra.mxu0 %v438_v58  ;;  %v413_v61 = vmax.f32 %v393_v56, 0.0  ;;  %v396_v62 = vadd.f32 %v607_v60, %v519_v10  ;;  %v387_v63 = vpop.f32.mrb[31].mxu1 }
 0x1d7   :  { %614 = vmatprep.subr.bf16.mxu0 %v646_v7  ;;  %v411_v0 = vmax.f32 %v385_v59, 0.0  ;;  %v388_v1 = vadd.f32 %v519_v10, %v387_v63 }
 0x1d8   :  { %v414_v2 = vmax.f32 %v396_v62, 0.0 }
 0x1d9   :  { %v412_v3 = vmax.f32 %v388_v1, 0.0 }
 0x1da   :  { %v422_v4 = vpack.c.bf16 %v414_v2, %v413_v61 }
 0x1db   :  { %v421_v5 = vpack.c.bf16 %v412_v3, %v411_v0 }
 0x1dc   :  { %v453_v11 = vsel %vm277_vm1, %v422_v4, 0 }
 0x1dd   :  { %v450_v10 = vsel %vm277_vm1, %v421_v5, 0 }
 0x1de   :  { %615 = vmatpush3.bf16.xpose.msra.mxu0 %v441_v6 }
 0x1df   :  { %616 = vmatprep.subr.bf16.mxu0 %v646_v7 }
 0x1e6   :  { %617 = vmatpush3.bf16.xpose.msra.mxu0 %v444_v8 }
 0x1e7   :  { %618 = vmatprep.subr.bf16.mxu0 %v646_v7 }
 0x1ee   :  { %619 = vmatpush3.bf16.xpose.msra.mxu0 %v447_v9 }
 0x1ef   :  { %620 = vmatprep.subr.bf16.mxu0 %v646_v7 }
 0x1f6   :  { %621 = vmatpush3.bf16.xpose.msra.mxu0 %v450_v10 }
 0x1f7   :  { %622 = vmatprep.subr.bf16.mxu0 %v646_v7 }
 0x1fe   :  { %623 = vmatpush3.bf16.xpose.msra.mxu0 %v453_v11 }
 0x205   :  { %625 = vmatmul.mubr.msk.bf16.vlgmr.msra.gmra.mrb[0].mxu0 %vm277_vm1, %v43_v12 }
 0x2d8   :  { %v489_v14 = vpop.f32.mrb[0].mxu0 }
 0x2d9   :  { %v490_v15 = vadd.f32 %v489_v14, %v426_v13  ;;  %v626_v16 = vpop.f32.mrb[1].mxu0 }
 0x2da   :  { %v492_v17 = vpop.f32.mrb[2].mxu0 }
 0x2db   :  { %495 = vst [vmem:[%s763_s3] sm:$0x3] %v490_v15  ;;  %v627_v18 = vpop.f32.mrb[3].mxu0 }

</bundles_post_ra>
